<compile_context>
chip_gen: v7x
topology: tpu7x:2x2x1
jax: 0.10.0
libtpu: 0.0.40
codegen_flags: <defaults>
</compile_context>

<pallas_src>
import math

import jax
import jax.numpy as jnp
from jax.experimental import pallas as pl
from jax.experimental.pallas import tpu as pltpu


def _round_up(v, m):
    return (v + m - 1) // m * m


# ---------------------------------------------------------------------------
# Fused kernel: y = x @ Wcat + bcat; n = softplus(y[:, :c_out]),
# p = sigmoid(y[:, c_out:]).  Two separate lane-exact outputs.
# ---------------------------------------------------------------------------
def _make_nbnorm_kernel(c_out):
    def kernel(x_ref, w_ref, b_ref, n_ref, p_ref):
        # f32 x f32 -> f32 on the MXU (memory-bound kernel; MXU has slack).
        y = jnp.dot(x_ref[...], w_ref[...], preferred_element_type=jnp.float32)
        y = y + b_ref[...]                       # bias broadcast, f32

        yn = y[:, :c_out]                        # 'n' head pre-activation
        yp = y[:, c_out:]                        # 'p' head pre-activation

        # Stable softplus: max(y, 0) + log1p(exp(-|y|))
        n_val = jnp.maximum(yn, 0.0) + jnp.log1p(jnp.exp(-jnp.abs(yn)))
        n_ref[...] = n_val.astype(n_ref.dtype)

        # Stable sigmoid sharing one exp + approx reciprocal (EUP-cheap).
        e = jnp.exp(-jnp.abs(yp))
        r = pl.reciprocal(1.0 + e, approx=True)
        p_val = jnp.where(yp >= 0.0, r, e * r)
        p_ref[...] = p_val.astype(p_ref.dtype)

    return kernel


def nbnorm_forward(x, Wn, bn, Wp, bp):
    """
    x  : (B, N, c_in, 1)  float32
    Wn : (c_out, c_in, 1, 1) conv weight for the 'n' head
    bn : (c_out,)            bias for the 'n' head
    Wp : (c_out, c_in, 1, 1) conv weight for the 'p' head
    bp : (c_out,)            bias for the 'p' head
    returns (n, p), each (B, N, c_out) float32
    """
    B, N, c_in, last = x.shape
    assert last == 1, "NBNorm forward squeezes a size-1 trailing dim"
    c_out = Wn.shape[0]
    C = 2 * c_out
    R = B * N

    # ---- flatten rows; combined weight/bias (tiny, lane-exact, f32) ----
    x2 = x.reshape(R, c_in)                               # no cast, no row pad
    Wcat = jnp.concatenate([Wn.reshape(c_out, c_in).T,
                            Wp.reshape(c_out, c_in).T], axis=1)   # (c_in, C)
    bcat = jnp.concatenate([bn, bp], axis=0).reshape(1, C)        # (1, C)

    # ---- row tiling: large tiles, always >=2 grid steps when possible ----
    R8 = _round_up(R, 8)
    tr = min(4096, R8)                   # big tile: per-step DMA >> 0.35us overhead
    if pl.cdiv(R, tr) < 2 and R8 >= 16:  # keep >=2 steps so v7x can use both TCs
        tr = _round_up(pl.cdiv(R8, 2), 8)
    grid_r = pl.cdiv(R, tr)              # ragged last block handled by Pallas

    kernel = _make_nbnorm_kernel(c_out)

    flops = 2 * R * c_in * C
    transcendentals = 4 * R * c_out              # ~2 EUP ops per output element
    bytes_accessed = (R * c_in * 4               # x (f32)
                      + c_in * C * 4             # Wcat
                      + C * 4                    # bias
                      + 2 * R * c_out * 4)       # n and p outputs (f32)
    cost = pl.CostEstimate(flops=flops,
                           transcendentals=transcendentals,
                           bytes_accessed=bytes_accessed)

    # Explicit VMEM budget with headroom; stays far below v7x's 64 MiB.
    per_step_bytes = 4 * (tr * c_in + c_in * C + C + 2 * tr * c_out)
    vmem_limit = min(max(3 * per_step_bytes, 8 << 20), 48 << 20)

    n2, p2 = pl.pallas_call(
        kernel,
        out_shape=(jax.ShapeDtypeStruct((R, c_out), x.dtype),
                   jax.ShapeDtypeStruct((R, c_out), x.dtype)),
        grid=(grid_r,),
        in_specs=[
            pl.BlockSpec((tr, c_in), lambda i: (i, 0)),   # x rows
            pl.BlockSpec((c_in, C), lambda i: (0, 0)),    # combined weight
            pl.BlockSpec((1, C), lambda i: (0, 0)),       # combined bias
        ],
        out_specs=(
            pl.BlockSpec((tr, c_out), lambda i: (i, 0)),  # n
            pl.BlockSpec((tr, c_out), lambda i: (i, 0)),  # p
        ),
        compiler_params=pltpu.CompilerParams(
            dimension_semantics=("parallel",),
            vmem_limit_bytes=vmem_limit,
        ),
        cost_estimate=cost,
    )(x2, Wcat, bcat)

    return n2.reshape(B, N, c_out), p2.reshape(B, N, c_out)


# TODO(synk): likelihood_loss / mean are not part of the forward pass and are
# left to plain JAX (lgamma has no benefit from a custom Pallas kernel here).


# ---------------------------------------------------------------------------
# Pure-JAX reference (mirrors the PyTorch forward) for correctness checking.
# ---------------------------------------------------------------------------
def nbnorm_reference(x, Wn, bn, Wp, bp):
    B, N, c_in, _ = x.shape
    c_out = Wn.shape[0]
    xf = x.reshape(B * N, c_in)
    yn = xf @ Wn.reshape(c_out, c_in).T + bn
    yp = xf @ Wp.reshape(c_out, c_in).T + bp
    n = jax.nn.softplus(yn).reshape(B, N, c_out)
    p = jax.nn.sigmoid(yp).reshape(B, N, c_out)
    return n, p


# ---------------------------------------------------------------------------
# Deterministic parameters / inputs and smoke test
# ---------------------------------------------------------------------------
def init_params(key, c_in, c_out):
    k1, k2, k3, k4 = jax.random.split(key, 4)
    bound = 1.0 / math.sqrt(c_in)   # PyTorch Conv2d default init bound (fan_in = c_in*1*1)
    Wn = jax.random.uniform(k1, (c_out, c_in, 1, 1), minval=-bound, maxval=bound,
                            dtype=jnp.float32)
    bn = jax.random.uniform(k2, (c_out,), minval=-bound, maxval=bound,
                            dtype=jnp.float32)
    Wp = jax.random.uniform(k3, (c_out, c_in, 1, 1), minval=-bound, maxval=bound,
                            dtype=jnp.float32)
    bp = jax.random.uniform(k4, (c_out,), minval=-bound, maxval=bound,
                            dtype=jnp.float32)
    return Wn, bn, Wp, bp


if __name__ == "__main__":
    # Small shapes consistent with the module: x is (batch, nodes, c_in, 1).
    B, N, c_in, c_out = 2, 16, 32, 32

    key = jax.random.PRNGKey(0)
    kx, kp = jax.random.split(key)

    x = jax.random.normal(kx, (B, N, c_in, 1), dtype=jnp.float32)
    Wn, bn, Wp, bp = init_params(kp, c_in, c_out)

    n, p = nbnorm_forward(x, Wn, bn, Wp, bp)
    n, p = jax.block_until_ready((n, p))

    n_ref, p_ref = nbnorm_reference(x, Wn, bn, Wp, bp)

    assert n.shape == (B, N, c_out)
    assert p.shape == (B, N, c_out)
    # Match the pure-JAX reference (approx reciprocal => loose-ish tolerance).
    assert bool(jnp.allclose(n, n_ref, rtol=2e-3, atol=2e-3))
    assert bool(jnp.allclose(p, p_ref, rtol=2e-3, atol=2e-3))
    # softplus output positive, sigmoid output in (0, 1] (==1.0 only from
    # f32 rounding at extreme logits, which does not occur at these scales).
    assert bool(jnp.all(n > 0.0))
    assert bool(jnp.all((p > 0.0) & (p <= 1.0)))

    print("KERNEL_OK")
</pallas_src>

<mosaic_0001>
module attributes {stable_mosaic.version = 11 : i64} {
  func.func @kernel(%arg0: i32, %arg1: memref<16x32xf32, #tpu.memory_space<vmem>>, %arg2: memref<32x64xf32, #tpu.memory_space<vmem>>, %arg3: memref<1x64xf32, #tpu.memory_space<vmem>>, %arg4: memref<16x32xf32, #tpu.memory_space<vmem>>, %arg5: memref<16x32xf32, #tpu.memory_space<vmem>>) attributes {dimension_semantics = [#tpu.dimension_semantics<parallel>], iteration_bounds = array<i64: 2>, scalar_prefetch = 0 : i64, scratch_operands = 0 : i64, tpu.core_type = #tpu.core_type<tc>, window_params = [{transform_indices = @transform_0, window_bounds = array<i64: 16, 32>}, {pipeline_mode = #tpu.pipeline_mode<synchronous>, transform_indices = @transform_1, window_bounds = array<i64: 32, 64>}, {pipeline_mode = #tpu.pipeline_mode<synchronous>, transform_indices = @transform_2, window_bounds = array<i64: 1, 64>}, {transform_indices = @transform_3, window_bounds = array<i64: 16, 32>}, {transform_indices = @transform_4, window_bounds = array<i64: 16, 32>}]} {
    %c0 = arith.constant 0 : index
    %c0_0 = arith.constant 0 : index
    %0 = vector.load %arg1[%c0, %c0_0] : memref<16x32xf32, #tpu.memory_space<vmem>>, vector<16x32xf32>
    %c0_1 = arith.constant 0 : index
    %c0_2 = arith.constant 0 : index
    %1 = vector.load %arg2[%c0_1, %c0_2] : memref<32x64xf32, #tpu.memory_space<vmem>>, vector<32x64xf32>
    %cst = arith.constant dense<0.000000e+00> : vector<16x64xf32>
    %2 = tpu.matmul %0, %1, %cst {dimension_numbers = #tpu.dot_dimension_numbers<[1], [0], [0], [1], [0, 0, 1, 1], [], []>} : vector<16x32xf32>, vector<32x64xf32>, vector<16x64xf32> -> vector<16x64xf32>
    %c0_3 = arith.constant 0 : index
    %c0_4 = arith.constant 0 : index
    %3 = vector.load %arg3[%c0_3, %c0_4] : memref<1x64xf32, #tpu.memory_space<vmem>>, vector<1x64xf32>
    %4 = vector.broadcast %3 : vector<1x64xf32> to vector<16x64xf32>
    %5 = arith.addf %2, %4 : vector<16x64xf32>
    %6 = vector.extract_strided_slice %5 {offsets = [0, 0], sizes = [16, 32], strides = [1, 1]} : vector<16x64xf32> to vector<16x32xf32>
    %7 = vector.extract_strided_slice %5 {offsets = [0, 32], sizes = [16, 32], strides = [1, 1]} : vector<16x64xf32> to vector<16x32xf32>
    %cst_5 = arith.constant 0.000000e+00 : f32
    %8 = vector.broadcast %cst_5 : f32 to vector<16x32xf32>
    %9 = arith.maximumf %6, %8 : vector<16x32xf32>
    %10 = math.absf %6 : vector<16x32xf32>
    %cst_6 = arith.constant 0.000000e+00 : f32
    %11 = vector.broadcast %cst_6 : f32 to vector<16x32xf32>
    %12 = arith.subf %11, %10 : vector<16x32xf32>
    %13 = math.exp %12 : vector<16x32xf32>
    %14 = math.log1p %13 : vector<16x32xf32>
    %15 = arith.addf %9, %14 : vector<16x32xf32>
    %c0_7 = arith.constant 0 : index
    %c0_8 = arith.constant 0 : index
    %16 = vector.load %arg4[%c0_7, %c0_8] : memref<16x32xf32, #tpu.memory_space<vmem>>, vector<16x32xf32>
    tpu.vector_store %arg4[%c0_7, %c0_8], %15 {strides = array<i32>} : memref<16x32xf32, #tpu.memory_space<vmem>>, vector<16x32xf32>,
    %17 = math.absf %7 : vector<16x32xf32>
    %cst_9 = arith.constant 0.000000e+00 : f32
    %18 = vector.broadcast %cst_9 : f32 to vector<16x32xf32>
    %19 = arith.subf %18, %17 : vector<16x32xf32>
    %20 = math.exp %19 : vector<16x32xf32>
    %cst_10 = arith.constant 1.000000e+00 : f32
    %21 = vector.broadcast %cst_10 : f32 to vector<16x32xf32>
    %22 = arith.addf %21, %20 : vector<16x32xf32>
    %23 = tpu.reciprocal %22 {approx = true} : vector<16x32xf32> -> vector<16x32xf32>
    %cst_11 = arith.constant 0.000000e+00 : f32
    %24 = vector.broadcast %cst_11 : f32 to vector<16x32xf32>
    %25 = arith.cmpf oge, %7, %24 : vector<16x32xf32>
    %26 = arith.mulf %20, %23 : vector<16x32xf32>
    %27 = arith.select %25, %23, %26 : vector<16x32xi1>, vector<16x32xf32>
    %c0_12 = arith.constant 0 : index
    %c0_13 = arith.constant 0 : index
    %28 = vector.load %arg5[%c0_12, %c0_13] : memref<16x32xf32, #tpu.memory_space<vmem>>, vector<16x32xf32>
    tpu.vector_store %arg5[%c0_12, %c0_13], %27 {strides = array<i32>} : memref<16x32xf32, #tpu.memory_space<vmem>>, vector<16x32xf32>,
    return
  }
  func.func @transform_0(%arg0: i32) -> (i32, i32) {
    %c0_i32 = arith.constant 0 : i32
    %c0_i32_0 = arith.constant 0 : i32
    return %arg0, %c0_i32 : i32, i32
  }
  func.func @transform_1(%arg0: i32) -> (i32, i32) {
    %c0_i32 = arith.constant 0 : i32
    %c0_i32_0 = arith.constant 0 : i32
    %c0_i32_1 = arith.constant 0 : i32
    return %c0_i32, %c0_i32_0 : i32, i32
  }
  func.func @transform_2(%arg0: i32) -> (i32, i32) {
    %c0_i32 = arith.constant 0 : i32
    %c0_i32_0 = arith.constant 0 : i32
    %c0_i32_1 = arith.constant 0 : i32
    return %c0_i32, %c0_i32_0 : i32, i32
  }
  func.func @transform_3(%arg0: i32) -> (i32, i32) {
    %c0_i32 = arith.constant 0 : i32
    %c0_i32_0 = arith.constant 0 : i32
    return %arg0, %c0_i32 : i32, i32
  }
  func.func @transform_4(%arg0: i32) -> (i32, i32) {
    %c0_i32 = arith.constant 0 : i32
    %c0_i32_0 = arith.constant 0 : i32
    return %arg0, %c0_i32 : i32, i32
  }
}

</mosaic_0001>

<bundles_post_ra>
// kernel: tpu_custom_call.1
= control target key start
LH: loop header
LB: loop body
LE: loop exit
PB: predicated region body
PF: predicated region fallthrough
CT: control target
= control target key end

     0   :  { %10 = vsyncpa [#allocation3], 0  ;;  %s1139_s0 = inlined_call_operand.hbm [shape: f32[32,32], index: 0, kind: input, shape index: {}]   ;;  %s1140_s1 = inlined_call_operand.hbm [shape: f32[32,64], index: 1, kind: input, shape index: {}]   ;;  %s1141_s2 = inlined_call_operand.vmem [shape: f32[1,64], index: 2, kind: input, shape index: {}]   ;;  %s1142_s3 = inlined_call_operand.hbm [shape: f32[32,32], index: 3, kind: output, shape index: {0}]   ;;  %s1143_s4 = inlined_call_operand.hbm [shape: f32[32,32], index: 4, kind: output, shape index: {1}]  }
   0x1   :  { %12 = vsyncpa [#allocation3 + $0x1], 0 }
   0x2   :  { %13 = vsyncpa [#allocation6], 0 }
   0x3   :  { %14 = vsyncpa [#allocation4], 0 }
   0x4   :  { %16 = vsyncpa [#allocation4 + $0x1], 0 }
   0x5   :  { %17 = vsyncpa [#allocation9], 0 }
   0x6   :  { %19 = vsyncpa [#allocation9 + $0x1], 0  ;;  %s868_s15 = smov 0   ;;  %s870_s16 = smov 0  }
   0x7   :  { %s872_s17 = smov 0   ;;  %s874_s18 = smov 0  }
   0x8 LB: > { %s889_s19 = sadd.s32 4294967295, %s832_s18   ;;  %s542_s20 = sadd.s32 4294967294, %s832_s18   ;;  %s832_s18 = sphi %s874_s18, %s1163_s18   ;;  %s828_s17 = sphi %s872_s17, %s1162_s17   ;;  %s824_s16 = sphi %s870_s16, %s1161_s16   ;;  %s820_s15 = sphi %s868_s15, %s1160_s15  }
   0x9   : > { %p45_p0 = scmp.ne.s32.totalorder %s824_s16, %s820_s15  ;;  %p1144_p1 = scmp.eq.s32.totalorder %s889_s19, 0 }
   0xa   : > { %p117_p3 = scmp.eq.s32.totalorder %s542_s20, 1  ;;  %p543_p5 = scmp.ge.s32.totalorder %s832_s18, 1 }
   0xb   : > { %p898_p4 = por %p1144_p1, %p45_p0  ;;  %p150_p7 = scmp.lt.s32.totalorder %s832_s18, 3 }
   0xc   : > { %p903_p6 = por %p117_p3, %p45_p0  ;;  %s834_s24 = smov [#allocation5]  }
   0xd   : > { %s1147_s21 = scalar_select %p898_p4, 1, 0 }
   0xe   : > { %s1148_s22 = scalar_select %p903_p6, 1, 0 }
   0xf   : > { %p908_p8 = pnand %p543_p5, %p150_p7  ;;  %s162_s25 = sshll.u32 %s834_s24, 4  ;;  %s912_s25 = int_to_ptr.vmem [resolvable:$true] %s162_s25 }
  0x10   : > { %s924_s27 = sadd.s32 1, %s832_s18   ;;  %s32_s28 = sadd.s32 1, %s828_s17 }
  0x11   : > { %s1149_s23 = scalar_select %p908_p8, 1, 0 }
  0x12   : > { %p603_p9 = pneg %p908_p8  ;;  %s29_s29 = ssub.s32 %s832_s18, %s924_s27 }
  0x13   : > { %s672_s6 = scalar_lea.hbm %s1140_s1, 512 }
  0x14   : > { %p919_p11 = pnand %p603_p9, %p1144_p1  ;;  %p673_p12 = scmp.ne.s32.totalorder %s1140_s1, %s672_s6 }
  0x15   : > { %p679_p5 = scmp.lt.u32.totalorder %s672_s6, %s1140_s1 }
  0x16   : > { %p674_p13 = pneg %p919_p11 }
  0x18   : > { %p675_p0 = pnand %p674_p13, %p673_p12 }
  0x1a   : > { %p676_p3 = pneg %p675_p0 }
  0x1c   : > { %p681_p7 = pnand %p679_p5, %p676_p3 }
  0x1e   : > { %684 = shalt.err (!%p681_p7)
}
  0x1f   : > { %s685_s11 = scalar_lea.vmem %s912_s25, 512  ;;  %p693_p2 = scmp.lt.s32.totalorder %s912_s25, %s912_s25 }
  0x20   : > { %p686_p9 = scmp.ne.s32.totalorder %s912_s25, %s685_s11  ;;  %p694_p6 = scmp.lt.s32.totalorder %s685_s11, %s685_s11 }
  0x22   : > { %p688_p10 = pnand %p686_p9, %p674_p13  ;;  %p695_p4 = por %p694_p6, %p693_p2 }
  0x24   : > { %p689_p1 = pneg %p688_p10 }
  0x26   : > { %p696_p8 = pnand %p695_p4, %p689_p1 }
  0x28   : > { %699 = shalt.err (!%p696_p8)
}
  0x29   : > { %s835_s12 = smov 128   ;;  %s836_s13 = smov 8  }
  0x2a   : > { %606 = dma.hbm_to_vmem [thread:$0]  (!%p919_p11), %s1140_s1, 512, %s912_s25, [#allocation6], %s835_s12, %s835_s12, %s836_s13  }
  0x2b   : > { %p30_p1 = scmp.eq.s32.totalorder %s29_s29, 0  ;;  %p39_p2 = scmp.ne.s32.totalorder %s828_s17, %s824_s16 }
  0x2c   : > { %p40_p4 = scmp.eq.s32.totalorder %s832_s18, 0  ;;  %p619_p6 = scmp.lt.s32.totalorder %s832_s18, 2 }
  0x2d   : > { %s958_s24 = scalar_select %p30_p1, %s828_s17, %s32_s28  }
  0x2e   : > { %p41_p8 = por %p40_p4, %p39_p2  ;;  %p1151_p10 = scmp.eq.s32.totalorder %s889_s19, 1 }
  0x2f   : > { %s179_s26 = sand.u32 1, %s828_s17   ;;  %s565_s5 = sshll.u32 %s832_s18, 8 }
  0x30   : > { %p962_p12 = por %p1151_p10, %p39_p2  ;;  %s546_s6 = sshll.u32 %s179_s26, 4 }
  0x31   : > { %s971_s9 = scalar_lea.hbm %s1139_s0, %s565_s5  ;;  %s183_s25 = scalar_lea.vmem [#allocation2], %s546_s6 }
  0x32   : > { %s190_s28 = sshll.u32 %s183_s25, 4  ;;  %p973_p11 = pnand %p619_p6, %p41_p8  ;;  %s977_s28 = int_to_ptr.vmem [resolvable:$true] %s190_s28 }
  0x33   : > { %s979_s10 = scalar_lea.sflag [#allocation3], %s179_s26  ;;  %s700_s11 = scalar_lea.hbm %s971_s9, 256 }
  0x34   : > { %p701_p13 = scmp.ne.s32.totalorder %s971_s9, %s700_s11  ;;  %p702_p0 = pneg %p973_p11 }
  0x35   : > { %s705_s5 = scalar_lea.hbm %s1139_s0, 512  ;;  %p706_p7 = scmp.lt.u32.totalorder %s971_s9, %s1139_s0 }
  0x36   : > { %p703_p3 = pnand %p702_p0, %p701_p13  ;;  %p707_p9 = scmp.lt.u32.totalorder %s705_s5, %s700_s11 }
  0x37   : > { %p709_p2 = scmp.lt.u32.totalorder %s700_s11, %s971_s9 }
  0x38   : > { %p704_p5 = pneg %p703_p3  ;;  %p708_p1 = por %p707_p9, %p706_p7 }
  0x3a   : > { %p710_p4 = por %p709_p2, %p708_p1 }
  0x3c   : > { %p711_p6 = pnand %p710_p4, %p704_p5 }
  0x3e   : > { %714 = shalt.err (!%p711_p6)
}
  0x3f   : > { %s715_s26 = scalar_lea.vmem %s977_s28, 256  ;;  %s837_s8 = smov [#allocation2]  }
  0x40   : > { %p716_p8 = scmp.ne.s32.totalorder %s977_s28, %s715_s26  ;;  %s720_s25 = sshll.u32 %s837_s8, 4  ;;  %s721_s25 = int_to_ptr.vmem [resolvable:$false] %s720_s25 }
  0x41   : > { %s722_s14 = scalar_lea.vmem %s721_s25, 512  ;;  %p723_p3 = scmp.lt.s32.totalorder %s977_s28, %s721_s25 }
  0x42   : > { %p718_p10 = pnand %p716_p8, %p702_p0  ;;  %p724_p7 = scmp.lt.s32.totalorder %s722_s14, %s715_s26 }
  0x44   : > { %p719_p13 = pneg %p718_p10  ;;  %p725_p9 = por %p724_p7, %p723_p3 }
  0x46   : > { %p726_p1 = pnand %p725_p9, %p719_p13 }
  0x48   : > { %729 = shalt.err (!%p726_p1)
}
  0x49   : > { %610 = dma.hbm_to_vmem [thread:$0]  (!%p973_p11), %s971_s9, 256, %s977_s28, %s979_s10, %s835_s12, %s835_s12, %s836_s13  }
  0x4a   : > { %p1154_p0 = scmp.ne.s32.totalorder %s1149_s23, 0 }
  0x4b   : > { %s1013_s11 = sand.u32 (!%p1154_p0), 1, %s824_s16   ;;  %p1155_p5 = scmp.ne.s32.totalorder (!%p1154_p0), %s1147_s21, 0 }
  0x4c   : > { %202 = sbr.rel (%p1154_p0) target bundleno = 492 (0x1ec), region = 32  ;;  %s1016_s20 = sshll.u32 (!%p1154_p0), %s1013_s11, 4 }
  0x4d   : > { %s205_s29 = scalar_lea.sflag (!%p1154_p0), [#allocation3], %s1013_s11  ;;  %s208_s5 = scalar_lea.vmem (!%p1154_p0), [#allocation2], %s1016_s20 }
  0x53   : > { %803 = dma.done.wait (%p1155_p5), %s205_s29, 256  }
  0x54   : > { %805 = vsyncadd (%p1155_p5), %s205_s29, 4294967040  ;;  %p1156_p11 = scmp.eq.s32.totalorder %s889_s19, 0 }
  0x56   : > { %807 = dma.done.wait (%p1156_p11), [#allocation6], 512   ;;  %p1157_p2 = pmov %p1156_p11 }
  0x57   : > { %vm258_vm0 = vcmask 261120   ;;  %v247_v0 = vld [vmem:[#allocation5] sm:$0xff]  ;;  %v248_v1 = vld [vmem:[#allocation5 + $0x8] sm:$0xff]  ;;  %v249_v2 = vld [vmem:[#allocation5 + $0x10] sm:$0xff]  ;;  %s566_s12 = sshll.u32 %s889_s19, 8  ;;  %s234_s13 = scalar_lea.vmem [#allocation7], %s1016_s20 }
  0x58   : > { %809 = vsyncadd (%p1157_p2), [#allocation6], 4294966784  ;;  %v585_v3 = vpack.c.bf16 %v248_v1, %v247_v0  ;;  %v250_v4 = vld [vmem:[#allocation5 + $0x18] sm:$0xff]  ;;  %v245_v5 = vld [vmem:[%s208_s5] sm:$0xff]  ;;  %s411_s9 = sshll.u32 %s234_s13, 4  ;;  %s1044_s6 = scalar_lea.hbm %s1142_s3, %s566_s12  ;;  %s1046_s9 = int_to_ptr.vmem [resolvable:$true] %s411_s9 }
  0x59   : > { %v589_v6 = vpack.c.bf16 %v250_v4, %v249_v2  ;;  %582 = vmatprep.mubr.msk.f32.mxu0 %vm258_vm0, %v245_v5  ;;  %v246_v7 = vld [vmem:[%s208_s5 + $0x8] sm:$0xff]  ;;  %v554_v8 = vld [vmem:[%s1141_s2] ss:$0 sm:$0xff]  ;;  %s838_s7 = smov 96   ;;  %s393_s26 = scalar_lea.sflag [#allocation4], %s1013_s11 }
  0x5a   : > { %586 = vmatprep.subr.bf16.mxu0 %v585_v3  ;;  %s730_s8 = scalar_lea.vmem %s1046_s9, 256  ;;  %s839_s25 = smov [#allocation7]  }
  0x5b   : > { %588 = vmatpush3.bf16.msra.mxu0 %v585_v3  ;;  %p731_p4 = scmp.ne.s32.totalorder %s1046_s9, %s730_s8  ;;  %s734_s14 = sshll.u32 %s839_s25, 4  ;;  %s735_s14 = int_to_ptr.vmem [resolvable:$false] %s734_s14 }
  0x5c   : > { %590 = vmatprep.subr.bf16.mxu0 %v589_v6  ;;  %s736_s29 = scalar_lea.vmem %s735_s14, 512  ;;  %p737_p10 = scmp.lt.s32.totalorder %s1046_s9, %s735_s14 }
  0x5d   : > { %p732_p6 = pnand %p731_p4, %p962_p12  ;;  %p738_p13 = scmp.lt.s32.totalorder %s736_s29, %s730_s8 }
  0x5f   : > { %592 = vmatpush3.bf16.msra.mxu0 %v589_v6  ;;  %p733_p8 = pneg %p732_p6  ;;  %p739_p3 = por %p738_p13, %p737_p10 }
  0x61   : > { %p740_p7 = pnand %p739_p3, %p733_p8 }
  0x62   : > { %583 = vmatmul.mubr.msk.f32.vlgmr.msra.gmra.mrb[0].mxu0 %vm258_vm0, %v246_v7 }
 0x135   : > { %v584_v9 = vpop.f32.mrb[0].mxu0 }
 0x136   : > { %v1033_v10 = vadd.f32 %v584_v9, %v554_v8  ;;  %v331_v11 = vpop.f32.mrb[1].mxu0 }
 0x137   : > { %v332_v12 = vadd.f32 %v554_v8, %v331_v11 }
 0x138   : > { %v343_v13 = vand.u32 2147483647, %v1033_v10  ;;  %v341_v34 = vmax.f32 %v1033_v10, 0.0  ;;  %vm377_vm4 = vcmp.ge.f32.partialorder %v1033_v10, 0.0 }
 0x139   : > { %v342_v14 = vand.u32 2147483647, %v332_v12  ;;  %v340_v39 = vmax.f32 %v332_v12, 0.0  ;;  %vm376_vm3 = vcmp.ge.f32.partialorder %v332_v12, 0.0 }
 0x13a   : > { %v345_v15 = vsub.f32 0.0, %v343_v13 }
 0x13b   : > { %v344_v16 = vsub.f32 0.0, %v342_v14 }
 0x13c   : > { %v348_v17 = vmul.f32 1.442695, %v345_v15 }
 0x13d   : > { %v346_v18 = vmul.f32 1.442695, %v344_v16 }
 0x13e   : > { %660 = vpow2.f32 %v348_v17 }
 0x13f   : > { %662 = vpow2.f32 %v346_v18 }
 0x148   : > { %v661_v19 = vpop.eup %660 }
 0x149   : > { %v663_v20 = vpop.eup %662  ;;  %v359_v21 = vadd.f32 1.0, %v661_v19  ;;  %v362_v23 = vmul.f32 -0.5, %v661_v19  ;;  %v365_v26 = vand.u32 2147483647, %v661_v19 }
 0x14a   : > { %v350_v22 = vadd.f32 1.0, %v663_v20  ;;  %v353_v24 = vmul.f32 -0.5, %v663_v20  ;;  %v356_v28 = vand.u32 2147483647, %v663_v20 }
 0x14b   : > { %664 = vlog2.f32 %v359_v21  ;;  %v363_v25 = vadd.f32 1.0, %v362_v23  ;;  %vm366_vm1 = vcmp.lt.f32.partialorder %v365_v26, 0.0004427343 }
 0x14c   : > { %666 = vlog2.f32 %v350_v22  ;;  %v354_v27 = vadd.f32 1.0, %v353_v24  ;;  %vm357_vm2 = vcmp.lt.f32.partialorder %v356_v28, 0.0004427343 }
 0x14d   : > { %668 = vrcp.f32 %v350_v22  ;;  %v364_v32 = vmul.f32 %v661_v19, %v363_v25 }
 0x14e   : > { %670 = vrcp.f32 %v359_v21  ;;  %v355_v36 = vmul.f32 %v663_v20, %v354_v27 }
 0x155   : > { %v665_v29 = vpop.eup %664 }
 0x156   : > { %v667_v30 = vpop.eup %666  ;;  %v361_v31 = vmul.f32 0.6931472, %v665_v29 }
 0x157   : > { %v669_v33 = vpop.eup %668  ;;  %v352_v35 = vmul.f32 0.6931472, %v667_v30 }
 0x158   : > { %v671_v37 = vpop.eup %670  ;;  %v367_v38 = vsel %vm366_vm1, %v364_v32, %v361_v31  ;;  %v378_v40 = vmul.f32 %v669_v33, %v663_v20 }
 0x159   : > { %v369_v41 = vadd.f32 %v367_v38, %v341_v34  ;;  %v358_v42 = vsel %vm357_vm2, %v355_v36, %v352_v35  ;;  %v379_v45 = vmul.f32 %v671_v37, %v661_v19 }
 0x15a   : > { %v368_v43 = vadd.f32 %v358_v42, %v340_v39  ;;  %v380_v44 = vsel %vm376_vm3, %v669_v33, %v378_v40 }
 0x15b   : > { %371 = vst.msk [vmem:[%s234_s13 + $0x8] sm:$0xff] %vm258_vm0, %v369_v41  ;;  %384 = vrot.lane.b32.xlu0 %v380_v44, %s838_s7 }
 0x15c   : > { %370 = vst.msk [vmem:[%s234_s13] sm:$0xff] %vm258_vm0, %v368_v43 }
 0x15d   : > { %743 = shalt.err (!%p740_p7)
}
 0x15e   : > { %s744_s5 = scalar_lea.hbm %s1044_s6, 256  ;;  %s748_s13 = scalar_lea.hbm %s1142_s3, 512 }
 0x15f   : > { %p745_p9 = scmp.ne.s32.totalorder %s1044_s6, %s744_s5  ;;  %p749_p5 = scmp.lt.u32.totalorder %s1044_s6, %s1142_s3 }
 0x160   : > { %p750_p11 = scmp.lt.u32.totalorder %s748_s13, %s744_s5  ;;  %p752_p4 = scmp.lt.u32.totalorder %s744_s5, %s1044_s6 }
 0x161   : > { %p746_p1 = pnand %p745_p9, %p962_p12 }
 0x162   : > { %p751_p2 = por %p750_p11, %p749_p5 }
 0x163   : > { %p747_p0 = pneg %p746_p1 }
 0x164   : > { %p753_p6 = por %p752_p4, %p751_p2 }
 0x166   : > { %p754_p8 = pnand %p753_p6, %p747_p0 }
 0x168   : > { %757 = shalt.err (!%p754_p8)
}
 0x169   : > { %s840_s8 = smov 128   ;;  %s841_s25 = smov 8   ;;  %v381_v46 = vsel %vm377_vm4, %v671_v37, %v379_v45 }
 0x16a   : > { %599 = dma.vmem_to_hbm [thread:$0]  (%p962_p12), %s1046_s9, 256, %s1044_s6, %s393_s26, %s840_s8, %s840_s8, %s841_s25  }
 0x16b   : > { %386 = vrot.lane.b32.xlu0 %v381_v46, %s838_s7  ;;  %s241_s14 = scalar_lea.vmem [#allocation8], %s1016_s20  ;;  %s1091_s9 = scalar_lea.hbm %s1143_s4, %s566_s12 }
 0x16c   : > { %s427_s29 = sshll.u32 %s241_s14, 4  ;;  %s398_s6 = scalar_lea.sflag [#allocation9], %s1013_s11  ;;  %s1084_s29 = int_to_ptr.vmem [resolvable:$true] %s427_s29 }
 0x16d   : > { %s758_s20 = scalar_lea.vmem %s1084_s29, 256  ;;  %s842_s7 = smov [#allocation8]  }
 0x16e   : > { %p759_p10 = scmp.ne.s32.totalorder %s1084_s29, %s758_s20  ;;  %s762_s26 = sshll.u32 %s842_s7, 4  ;;  %s763_s26 = int_to_ptr.vmem [resolvable:$false] %s762_s26 }
 0x16f   : > { %s764_s19 = scalar_lea.vmem %s763_s26, 512  ;;  %p765_p7 = scmp.lt.s32.totalorder %s1084_s29, %s763_s26 }
 0x170   : > { %p760_p13 = pnand %p759_p10, %p962_p12  ;;  %p766_p9 = scmp.lt.s32.totalorder %s764_s19, %s758_s20 }
 0x172   : > { %p761_p3 = pneg %p760_p13  ;;  %p767_p1 = por %p766_p9, %p765_p7 }
 0x174   : > { %p768_p0 = pnand %p767_p1, %p761_p3 }
 0x1cd   : > { %v385_v47 = vpop.permute.xlu0 %384 }
 0x1ce   : > { %390 = vst.msk [vmem:[%s241_s14] sm:$0xff] %vm258_vm0, %v385_v47 }
 0x1dd   : > { %v387_v48 = vpop.permute.xlu0 %386 }
 0x1de   : > { %391 = vst.msk [vmem:[%s241_s14 + $0x8] sm:$0xff] %vm258_vm0, %v387_v48 }
 0x1df   : > { %771 = shalt.err (!%p768_p0)
}
 0x1e0   : > { %s772_s12 = scalar_lea.hbm %s1091_s9, 256  ;;  %s776_s28 = scalar_lea.hbm %s1143_s4, 512 }
 0x1e1   : > { %p773_p5 = scmp.ne.s32.totalorder %s1091_s9, %s772_s12  ;;  %p777_p4 = scmp.lt.u32.totalorder %s1091_s9, %s1143_s4 }
 0x1e2   : > { %p778_p6 = scmp.lt.u32.totalorder %s776_s28, %s772_s12  ;;  %p780_p10 = scmp.lt.u32.totalorder %s772_s12, %s1091_s9 }
 0x1e3   : > { %p774_p11 = pnand %p773_p5, %p962_p12 }
 0x1e4   : > { %p779_p8 = por %p778_p6, %p777_p4 }
 0x1e5   : > { %p775_p2 = pneg %p774_p11 }
 0x1e6   : > { %p781_p13 = por %p780_p10, %p779_p8 }
 0x1e8   : > { %p782_p3 = pnand %p781_p13, %p775_p2 }
 0x1ea   : > { %785 = shalt.err (!%p782_p3)
}
 0x1eb   : > { %600 = dma.vmem_to_hbm [thread:$0]  (%p962_p12), %s1084_s29, 256, %s1091_s9, %s398_s6, %s840_s8, %s840_s8, %s841_s25  }
 0x1ec PF: > { %s442_s5 = sand.u32 1, %s820_s15   ;;  %p1158_p7 = scmp.ne.s32.totalorder %s1148_s22, 0 }
 0x1ed   : > { %p1159_p9 = scmp.ge.s32.totalorder %s832_s18, 2  ;;  %s443_s21 = scalar_lea.sflag [#allocation4], %s442_s5 }
 0x1ef   : > { %p612_p1 = pnand %p1159_p9, %p1158_p7 }
 0x1f1   : > { %811 = dma.done.wait (!%p612_p1), %s443_s21, 256  }
 0x1f2   : > { %813 = vsyncadd (!%p612_p1), %s443_s21, 4294967040  ;;  %s452_s30 = scalar_lea.sflag [#allocation9], %s442_s5 }
 0x1f3   : > { %815 = dma.done.wait (!%p612_p1), %s452_s30, 256  }
 0x1f4   : > { %817 = vsyncadd (!%p612_p1), %s452_s30, 4294967040  ;;  %p22_p12 = scmp.ge.s32.totalorder %s924_s27, 4   ;;  %s1160_s15 = smov %s824_s16 }
 0x1f5   : > { %s1161_s16 = smov %s828_s17  ;;  %s1162_s17 = smov %s958_s24 }
 0x1f6   : > { %s1163_s18 = smov %s924_s27  ;;  %24 = sbr.rel (!%p22_p12) target bundleno = 8 (0x8), region = 98 }
 0x1fd   :  { %457 = vsyncpa [#allocation3], 1 }
 0x1fe   :  { %459 = vsyncpa [#allocation3 + $0x1], 1 }
 0x1ff   :  { %460 = vsyncpa [#allocation6], 1 }
 0x200   :  { %461 = vsyncpa [#allocation4], 1 }
 0x201   :  { %463 = vsyncpa [#allocation4 + $0x1], 1 }
 0x202   :  { %464 = vsyncpa [#allocation9], 1 }
 0x203   :  { %466 = vsyncpa [#allocation9 + $0x1], 1 }

</bundles_post_ra>
